<compile_context>
chip_gen: v6e
topology: v6e:2x2x1
jax: 0.10.0
libtpu: 0.0.40
codegen_flags: <defaults>
</compile_context>

<pallas_src>
import functools

import jax
import jax.numpy as jnp
from jax import lax
from jax.experimental import pallas as pl
from jax.experimental.pallas import tpu as pltpu


# --------------------------------------------------------------------------------------
# Small tiled linear kernel: Y = X @ W + b  (used for the fused QKV projection and for
# the output projection — the latter as a single contraction of depth E).
# --------------------------------------------------------------------------------------
def _linear_kernel(x_ref, w_ref, b_ref, o_ref):
    acc = jnp.dot(x_ref[...], w_ref[...], preferred_element_type=jnp.float32)
    o_ref[...] = (acc + b_ref[...]).astype(o_ref.dtype)


def _pick_tile(dim, pref):
    return pref if (dim >= pref and dim % pref == 0) else dim


def _linear(x2d, w, b32, *, tm_pref=256, tn_pref=256):
    """x2d: [M, K], w: [K, N], b32: [1, N] float32. Returns [M, N] in x2d.dtype."""
    M, K = x2d.shape
    _, N = w.shape
    tm = _pick_tile(M, tm_pref)
    tn = _pick_tile(N, tn_pref)
    return pl.pallas_call(
        _linear_kernel,
        out_shape=jax.ShapeDtypeStruct((M, N), x2d.dtype),
        grid_spec=pltpu.PrefetchScalarGridSpec(
            num_scalar_prefetch=0,
            grid=(M // tm, N // tn),
            in_specs=[
                pl.BlockSpec((tm, K), lambda i, j: (i, 0)),
                pl.BlockSpec((K, tn), lambda i, j: (0, j)),
                pl.BlockSpec((1, tn), lambda i, j: (0, j)),
            ],
            out_specs=pl.BlockSpec((tm, tn), lambda i, j: (i, j)),
        ),
        compiler_params=pltpu.CompilerParams(
            dimension_semantics=("parallel", "parallel")),
    )(x2d, w, b32)


# --------------------------------------------------------------------------------------
# Flash-attention core. Grid = (B, H, S//TQ, S//TK); KV axis last / "arbitrary".
# Scratch-backed online-softmax carries; init / finalize gated by pl.when.
# --------------------------------------------------------------------------------------
def _flash_attn_kernel(q_ref, k_ref, v_ref, o_ref, m_sc, l_sc, acc_sc):
    ki = pl.program_id(3)

    @pl.when(ki == 0)
    def _():
        m_sc[...] = jnp.full_like(m_sc, -jnp.inf)
        l_sc[...] = jnp.zeros_like(l_sc)
        acc_sc[...] = jnp.zeros_like(acc_sc)

    q = q_ref[0, 0]                                                   # (TQ, D)
    k = k_ref[0, 0]                                                   # (TK, D)
    v = v_ref[0, 0]                                                   # (TK, D)

    # q @ k^T with the transpose folded into the contraction (no XLU transpose).
    s = lax.dot_general(q, k, dimension_numbers=(((1,), (1,)), ((), ())),
                        preferred_element_type=jnp.float32)           # (TQ, TK)

    m_prev = m_sc[...]
    m_new = jnp.maximum(m_prev, jnp.max(s, axis=-1, keepdims=True))
    alpha = jnp.exp(m_prev - m_new)
    p = jnp.exp(s - m_new)
    l_sc[...] = alpha * l_sc[...] + jnp.sum(p, axis=-1, keepdims=True)
    acc_sc[...] = alpha * acc_sc[...] + jnp.dot(p.astype(v.dtype), v,
                                                preferred_element_type=jnp.float32)
    m_sc[...] = m_new

    @pl.when(ki == pl.num_programs(3) - 1)
    def _():
        inv_l = pl.reciprocal(l_sc[...], approx=False)   # exact: tight reference parity
        o_ref[0, 0] = (acc_sc[...] * inv_l).astype(o_ref.dtype)


def _flash_attention(q, k, v, *, tq, tk):
    """q, k, v: [B, H, S, D]. Returns [B, H, S, D] (softmax(q k^T) v, scale pre-folded)."""
    B, H, S, D = q.shape
    itemsize = q.dtype.itemsize
    flops = 4 * B * H * S * S * D                       # scores + p@v
    transcendentals = B * H * S * S                     # exp(p) (rescale exps negligible)
    bytes_accessed = itemsize * (B * H * S * D          # q (read once per tile)
                                 + 2 * B * H * S * D * (S // tq)   # k, v re-streamed
                                 + B * H * S * D)                  # output
    return pl.pallas_call(
        _flash_attn_kernel,
        out_shape=jax.ShapeDtypeStruct((B, H, S, D), q.dtype),
        grid_spec=pltpu.PrefetchScalarGridSpec(
            num_scalar_prefetch=0,
            grid=(B, H, S // tq, S // tk),
            in_specs=[
                pl.BlockSpec((1, 1, tq, D), lambda b, h, qi, ki: (b, h, qi, 0)),
                pl.BlockSpec((1, 1, tk, D), lambda b, h, qi, ki: (b, h, ki, 0)),
                pl.BlockSpec((1, 1, tk, D), lambda b, h, qi, ki: (b, h, ki, 0)),
            ],
            out_specs=pl.BlockSpec((1, 1, tq, D), lambda b, h, qi, ki: (b, h, qi, 0)),
            scratch_shapes=[
                pltpu.VMEM((tq, 1), jnp.float32),    # m (running max)
                pltpu.VMEM((tq, 1), jnp.float32),    # l (running denom)
                pltpu.VMEM((tq, D), jnp.float32),    # unnormalized accumulator
            ],
        ),
        compiler_params=pltpu.CompilerParams(
            dimension_semantics=("parallel", "parallel", "parallel", "arbitrary")),
        cost_estimate=pl.CostEstimate(flops=flops,
                                      transcendentals=transcendentals,
                                      bytes_accessed=bytes_accessed),
    )(q, k, v)


# --------------------------------------------------------------------------------------
# Full module forward.
# --------------------------------------------------------------------------------------
def self_attention(x, wq, wk, wv, wo, bo, *, n_heads, tq=None, tk=None):
    """x: [B, S, E]; wq/wk/wv/wo: [E, E] ([in, out]); bo: [E]. Returns [B, S, E]."""
    B, S, E = x.shape
    D = E // n_heads
    # 128 matches the v5e MXU depth; bump to 256 on v6e (VMEM permits), re-check on v7x.
    if tq is None:
        tq = min(S, 128)
    if tk is None:
        tk = min(S, 128)
    assert S % tq == 0 and S % tk == 0, "sequence length must be divisible by tile sizes"

    # ---- Fused QKV projection, run ONCE (hoisted out of the attention kernel).
    # Scale folded into Wq so it is applied S times, not S*S times.
    scale = 1.0 / (D ** 0.5)
    w_qkv = jnp.concatenate([wq * scale, wk, wv], axis=1)              # [E, 3E]
    zero_bias = jnp.zeros((1, 3 * E), jnp.float32)
    qkv = _linear(x.reshape(B * S, E), w_qkv, zero_bias)               # [B*S, 3E]
    qkv = qkv.reshape(B, S, 3, n_heads, D)
    q = qkv[:, :, 0].transpose(0, 2, 1, 3)                             # [B, H, S, D]
    k = qkv[:, :, 1].transpose(0, 2, 1, 3)
    v = qkv[:, :, 2].transpose(0, 2, 1, 3)

    # ---- Flash attention core (Pallas).
    attn = _flash_attention(q, k, v, tq=tq, tk=tk)                     # [B, H, S, D]

    # ---- Output projection: ONE contraction of depth E (fills the MXU), plus bias.
    attn = attn.transpose(0, 2, 1, 3).reshape(B * S, E)
    out = _linear(attn, wo, bo.reshape(1, E).astype(jnp.float32))      # [B*S, E]
    return out.reshape(B, S, E)


# --------------------------------------------------------------------------------------
# Pure-JAX reference (mirrors the PyTorch module, weights stored [in, out]).
# --------------------------------------------------------------------------------------
def _reference(x, wq, wk, wv, wo, bo, n_heads):
    B, S, E = x.shape
    D = E // n_heads
    q = (x @ wq).reshape(B, S, n_heads, D).transpose(0, 2, 1, 3)
    k = (x @ wk).reshape(B, S, n_heads, D).transpose(0, 2, 1, 3)
    v = (x @ wv).reshape(B, S, n_heads, D).transpose(0, 2, 1, 3)
    s = jnp.einsum("bhqd,bhkd->bhqk", q, k) / (D ** 0.5)
    p = jax.nn.softmax(s, axis=-1)
    o = jnp.einsum("bhqk,bhkd->bhqd", p, v)
    o = o.transpose(0, 2, 1, 3).reshape(B, S, E)
    return o @ wo + bo


if __name__ == "__main__":
    # Small shapes consistent with the module: B=2, S=8, embed_dim=32, n_heads=4.
    B, S, E, H = 2, 8, 32, 4
    key = jax.random.PRNGKey(0)
    kx, kq, kk, kvk, ko, kb = jax.random.split(key, 6)

    x = jax.random.normal(kx, (B, S, E), dtype=jnp.float32)
    wscale = 1.0 / (E ** 0.5)
    wq = jax.random.normal(kq, (E, E), dtype=jnp.float32) * wscale
    wk = jax.random.normal(kk, (E, E), dtype=jnp.float32) * wscale
    wv = jax.random.normal(kvk, (E, E), dtype=jnp.float32) * wscale
    wo = jax.random.normal(ko, (E, E), dtype=jnp.float32) * wscale
    bo = jax.random.normal(kb, (E,), dtype=jnp.float32) * 0.01

    out = self_attention(x, wq, wk, wv, wo, bo, n_heads=H)
    out = jax.block_until_ready(out)

    ref = _reference(x, wq, wk, wv, wo, bo, H)
    assert out.shape == ref.shape
    assert jnp.allclose(out, ref, atol=1e-3, rtol=1e-3), "mismatch vs JAX reference"

    print("KERNEL_OK")
</pallas_src>

<mosaic_0001>
module attributes {stable_mosaic.version = 11 : i64} {
  func.func @_linear_kernel(%arg0: i32, %arg1: i32, %arg2: memref<16x32xf32, #tpu.memory_space<vmem>>, %arg3: memref<32x96xf32, #tpu.memory_space<vmem>>, %arg4: memref<1x96xf32, #tpu.memory_space<vmem>>, %arg5: memref<16x96xf32, #tpu.memory_space<vmem>>) attributes {dimension_semantics = [#tpu.dimension_semantics<parallel>, #tpu.dimension_semantics<parallel>], iteration_bounds = array<i64: 1, 1>, scalar_prefetch = 0 : i64, scratch_operands = 0 : i64, tpu.core_type = #tpu.core_type<tc>, window_params = [{transform_indices = @transform_0, window_bounds = array<i64: 16, 32>}, {transform_indices = @transform_1, window_bounds = array<i64: 32, 96>}, {transform_indices = @transform_2, window_bounds = array<i64: 1, 96>}, {transform_indices = @transform_3, window_bounds = array<i64: 16, 96>}]} {
    %c0 = arith.constant 0 : index
    %c0_0 = arith.constant 0 : index
    %0 = vector.load %arg2[%c0, %c0_0] : memref<16x32xf32, #tpu.memory_space<vmem>>, vector<16x32xf32>
    %c0_1 = arith.constant 0 : index
    %c0_2 = arith.constant 0 : index
    %1 = vector.load %arg3[%c0_1, %c0_2] : memref<32x96xf32, #tpu.memory_space<vmem>>, vector<32x96xf32>
    %cst = arith.constant dense<0.000000e+00> : vector<16x96xf32>
    %2 = tpu.matmul %0, %1, %cst {dimension_numbers = #tpu.dot_dimension_numbers<[1], [0], [0], [1], [0, 0, 1, 1], [], []>} : vector<16x32xf32>, vector<32x96xf32>, vector<16x96xf32> -> vector<16x96xf32>
    %c0_3 = arith.constant 0 : index
    %c0_4 = arith.constant 0 : index
    %3 = vector.load %arg4[%c0_3, %c0_4] : memref<1x96xf32, #tpu.memory_space<vmem>>, vector<1x96xf32>
    %4 = vector.broadcast %3 : vector<1x96xf32> to vector<16x96xf32>
    %5 = arith.addf %2, %4 : vector<16x96xf32>
    %c0_5 = arith.constant 0 : index
    %c0_6 = arith.constant 0 : index
    %6 = vector.load %arg5[%c0_5, %c0_6] : memref<16x96xf32, #tpu.memory_space<vmem>>, vector<16x96xf32>
    tpu.vector_store %arg5[%c0_5, %c0_6], %5 {strides = array<i32>} : memref<16x96xf32, #tpu.memory_space<vmem>>, vector<16x96xf32>,
    return
  }
  func.func @transform_0(%arg0: i32, %arg1: i32) -> (i32, i32) {
    %c0_i32 = arith.constant 0 : i32
    %c0_i32_0 = arith.constant 0 : i32
    return %arg0, %c0_i32 : i32, i32
  }
  func.func @transform_1(%arg0: i32, %arg1: i32) -> (i32, i32) {
    %c0_i32 = arith.constant 0 : i32
    %c0_i32_0 = arith.constant 0 : i32
    return %c0_i32, %arg1 : i32, i32
  }
  func.func @transform_2(%arg0: i32, %arg1: i32) -> (i32, i32) {
    %c0_i32 = arith.constant 0 : i32
    %c0_i32_0 = arith.constant 0 : i32
    return %c0_i32, %arg1 : i32, i32
  }
  func.func @transform_3(%arg0: i32, %arg1: i32) -> (i32, i32) {
    %c0_i32 = arith.constant 0 : i32
    return %arg0, %arg1 : i32, i32
  }
}

</mosaic_0001>

<bundles_post_ra>
// kernel: tpu_custom_call.1
= control target key start
LH: loop header
LB: loop body
LE: loop exit
PB: predicated region body
PF: predicated region fallthrough
CT: control target
= control target key end

     0   :  { %8 = vsyncpa [#allocation3], 0  ;;  %s298_s0 = inlined_call_operand.hbm [shape: f32[16,32], index: 0, kind: input, shape index: {}]   ;;  %s299_s1 = inlined_call_operand.hbm [shape: f32[32,96], index: 1, kind: input, shape index: {}]   ;;  %s300_s2 = inlined_call_operand.vmem [shape: f32[1,96], index: 2, kind: input, shape index: {}]   ;;  %s301_s3 = inlined_call_operand.hbm [shape: f32[16,96], index: 3, kind: output, shape index: {}]  }
   0x1   :  { %9 = vsyncpa [#allocation6], 0 }
   0x2   :  { %10 = vsyncpa [#allocation4], 0  ;;  %s250_s12 = smov [#allocation2]  }
   0x3   :  { %s16_s13 = sshll.u32 %s250_s12, 4  ;;  %s17_s13 = int_to_ptr.vmem [resolvable:$true] %s16_s13 }
   0x4   :  { %s192_s14 = scalar_lea.vmem %s17_s13, 256  ;;  %p197_p1 = scmp.lt.s32.totalorder %s17_s13, %s17_s13 }
   0x5   :  { %p193_p0 = scmp.ne.s32.totalorder %s17_s13, %s192_s14  ;;  %p198_p2 = scmp.lt.s32.totalorder %s192_s14, %s192_s14 }
   0x7   :  { %p199_p3 = por %p198_p2, %p197_p1 }
   0x9   :  { %p200_p4 = pnand %p199_p3, %p193_p0 }
   0xb   :  { %203 = shalt.err (!%p200_p4)
}
   0xc   :  { %s251_s15 = smov 128   ;;  %s252_s16 = smov 8  }
   0xd   :  { %22 = dma.hbm_to_vmem [thread:$0]  %s298_s0, 256, %s17_s13, [#allocation3], %s251_s15, %s251_s15, %s252_s16  }
   0xe   :  { %s253_s19 = smov [#allocation5]  }
   0xf   :  { %s28_s20 = sshll.u32 %s253_s19, 4  ;;  %s29_s20 = int_to_ptr.vmem [resolvable:$true] %s28_s20 }
  0x10   :  { %s212_s21 = scalar_lea.vmem %s29_s20, 512  ;;  %p217_p6 = scmp.lt.s32.totalorder %s29_s20, %s29_s20 }
  0x11   :  { %p213_p5 = scmp.ne.s32.totalorder %s29_s20, %s212_s21  ;;  %p218_p7 = scmp.lt.s32.totalorder %s212_s21, %s212_s21 }
  0x13   :  { %p219_p8 = por %p218_p7, %p217_p6 }
  0x15   :  { %p220_p9 = pnand %p219_p8, %p213_p5 }
  0x17   :  { %223 = shalt.err (!%p220_p9)
}
  0x18   :  { %34 = dma.hbm_to_vmem [thread:$0]  %s299_s1, 512, %s29_s20, [#allocation6], %s251_s15, %s251_s15, %s252_s16  }
  0x19   :  { %244 = dma.done.wait [#allocation3], 256  }
  0x1a   :  { %245 = vsyncadd [#allocation3], 4294967040 }
  0x1b   :  { %246 = dma.done.wait [#allocation6], 512  }
  0x1c   :  { %247 = vsyncadd [#allocation6], 4294966784  ;;  %vm56_vm0 = vcmask 261120   ;;  %v48_v0 = vld [vmem:[#allocation5 + $0x18] sm:$0xff]  ;;  %v47_v1 = vld [vmem:[#allocation5 + $0x10] sm:$0xff]  ;;  %vm138_vm1 = vcmask 785408  }
  0x1d   :  { %168 = vmatprep.subr.mxu0 %v48_v0  ;;  %v43_v2 = vld [vmem:[#allocation2] sm:$0xff]  ;;  %v46_v3 = vld [vmem:[#allocation5 + $0x8] sm:$0xff]  ;;  %v45_v4 = vld [vmem:[#allocation5] sm:$0xff]  ;;  %s254_s24 = smov [#allocation7]  }
  0x1e   :  { %169 = vmatpush3.msra.mxu0 %v48_v0  ;;  %176 = vmatprep.mubr.msk.f32.mxu0 %vm56_vm0, %v43_v2  ;;  %v44_v5 = vld [vmem:[#allocation2 + $0x8] sm:$0xff]  ;;  %v159_v6 = vld [vmem:[%s300_s2] ss:$0 sm:$0xff]  ;;  %s146_s25 = sshll.u32 %s254_s24, 4  ;;  %s147_s25 = int_to_ptr.vmem [resolvable:$true] %s146_s25 }
  0x1f   :  { %170 = vmatprep.subr.mxu0 %v47_v1  ;;  %s224_s26 = scalar_lea.vmem %s147_s25, 256  ;;  %p229_p11 = scmp.lt.s32.totalorder %s147_s25, %s147_s25 }
  0x20   :  { %171 = vmatpush3.msra.mxu0 %v47_v1  ;;  %p225_p10 = scmp.ne.s32.totalorder %s147_s25, %s224_s26  ;;  %p230_p12 = scmp.lt.s32.totalorder %s224_s26, %s224_s26 }
  0x21   :  { %172 = vmatprep.subr.mxu0 %v46_v3 }
  0x22   :  { %173 = vmatpush3.msra.mxu0 %v46_v3  ;;  %p231_p13 = por %p230_p12, %p229_p11 }
  0x23   :  { %174 = vmatprep.subr.mxu0 %v45_v4 }
  0x24   :  { %175 = vmatpush3.msra.mxu0 %v45_v4  ;;  %p232_p0 = pnand %p231_p13, %p225_p10 }
  0x25   :  { %177 = vmatmul.mubr.msk.f32.vlgmr.msra.gmra.mxu0 %vm56_vm0, %v44_v5 }
  0xe5   :  { %v178_v7 = vpop.f32.mrf.mxu0 }
  0xe6   :  { %v135_v8 = vadd.f32 %v178_v7, %v159_v6 }
  0xe7   :  { %v129_v9 = vpop.f32.mrf.mxu0 }
  0xe8   :  { %v130_v10 = vadd.f32 %v159_v6, %v129_v9  ;;  %140 = vst.msk [vmem:[#allocation7 + $0x8] sm:$0xff] %vm138_vm1, %v135_v8 }
  0xea   :  { %139 = vst.msk [vmem:[#allocation7] sm:$0xff] %vm138_vm1, %v130_v10 }
  0xeb   :  { %235 = shalt.err (!%p232_p0)
}
  0xec   :  { %152 = dma.vmem_to_hbm [thread:$0]  %s147_s25, 256, %s301_s3, [#allocation4], %s251_s15, %s251_s15, %s252_s16  }
  0xed   :  { %248 = dma.done.wait [#allocation4], 256  }
  0xee   :  { %249 = vsyncadd [#allocation4], 4294967040 }
  0xef   :  { %156 = vsyncpa [#allocation3], 1 }
  0xf0   :  { %157 = vsyncpa [#allocation6], 1 }
  0xf1   :  { %158 = vsyncpa [#allocation4], 1 }

</bundles_post_ra>
